<compile_context>
chip_gen: v7x
topology: tpu7x:2x2x1
jax: 0.10.0
libtpu: 0.0.40
codegen_flags: <defaults>
</compile_context>

<pallas_src>
import functools

import jax
import jax.numpy as jnp
from jax.experimental import pallas as pl
from jax.experimental.pallas import tpu as pltpu


def _row_tile(m, max_tile=256):
    """Largest row tile <= max_tile that divides m (multiple of 8 when possible)."""
    for t in (512, 256, 128, 64, 32, 16, 8):
        if t <= max_tile and m % t == 0:
            return t
    return m


# ----------------------------------------------------------------------------
# QKV projection (+ fused pre-LayerNorm, + folded 1/sqrt(d_head) on the q columns)
# ----------------------------------------------------------------------------
def _qkv_kernel(x_ref, w_ref, cs_ref, g_ref, b_ref, o_ref, *, pre_lnorm, eps):
    x = x_ref[...]                                           # (Tm, d_model) f32
    if pre_lnorm:
        mu = jnp.mean(x, axis=-1, keepdims=True)
        xc = x - mu
        var = jnp.mean(xc * xc, axis=-1, keepdims=True)
        x = xc * jax.lax.rsqrt(var + eps) * g_ref[...] + b_ref[...]
    acc = jnp.dot(x.astype(jnp.bfloat16), w_ref[...],
                  preferred_element_type=jnp.float32)        # (Tm, 3*H*Dh) f32 accumulate
    o_ref[...] = (acc * cs_ref[...]).astype(o_ref.dtype)     # scale only the q columns


def qkv_project(x2d, w_bf16, col_scale, g, b, *, pre_lnorm, eps):
    m, d_model = x2d.shape
    n = w_bf16.shape[1]
    tm = _row_tile(m)
    return pl.pallas_call(
        functools.partial(_qkv_kernel, pre_lnorm=pre_lnorm, eps=eps),
        out_shape=jax.ShapeDtypeStruct((m, n), jnp.bfloat16),
        grid=(m // tm,),
        in_specs=[
            pl.BlockSpec((tm, d_model), lambda i: (i, 0)),
            pl.BlockSpec((d_model, n), lambda i: (0, 0)),
            pl.BlockSpec((1, n), lambda i: (0, 0)),
            pl.BlockSpec((1, d_model), lambda i: (0, 0)),
            pl.BlockSpec((1, d_model), lambda i: (0, 0)),
        ],
        out_specs=pl.BlockSpec((tm, n), lambda i: (i, 0)),
        compiler_params=pltpu.CompilerParams(dimension_semantics=("parallel",)),
    )(x2d, w_bf16, col_scale, g, b)


# ----------------------------------------------------------------------------
# Relative-position projection (small matmul, bf16 MXU, f32 accumulate)
# ----------------------------------------------------------------------------
def _rproj_kernel(r_ref, w_ref, o_ref):
    o_ref[...] = jnp.dot(r_ref[...].astype(jnp.bfloat16), w_ref[...],
                         preferred_element_type=jnp.float32).astype(o_ref.dtype)


def rel_project(r, w_bf16):
    rlen, d_model = r.shape
    hd = w_bf16.shape[1]
    tr = _row_tile(rlen)
    return pl.pallas_call(
        _rproj_kernel,
        out_shape=jax.ShapeDtypeStruct((rlen, hd), jnp.bfloat16),
        grid=(rlen // tr,),
        in_specs=[
            pl.BlockSpec((tr, d_model), lambda i: (i, 0)),
            pl.BlockSpec((d_model, hd), lambda i: (0, 0)),
        ],
        out_specs=pl.BlockSpec((tr, hd), lambda i: (i, 0)),
        compiler_params=pltpu.CompilerParams(dimension_semantics=("parallel",)),
    )(r, w_bf16)


# ----------------------------------------------------------------------------
# Fused attention: AC + BD matmuls, exact in-VMEM rel-shift, softmax, PV
# ----------------------------------------------------------------------------
def _attn_kernel(qkv_ref, r_ref, o_ref, *, n_head, d_head):
    hd = n_head * d_head
    qn = qkv_ref.shape[0]
    kn = r_ref.shape[0]

    # Lane-aligned slab loads (widths are multiples of 128 when hd % 128 == 0).
    q_all = qkv_ref[:, 0:hd]                 # (Q, HD) bf16, q pre-scaled by 1/sqrt(Dh)
    k_all = qkv_ref[:, hd:2 * hd]            # (K, HD) bf16
    v_all = qkv_ref[:, 2 * hd:3 * hd]        # (K, HD) bf16
    r_all = r_ref[...]                       # (R, HD) bf16

    # _rel_shift selection masks, shared by all heads (hoisted out of the head loop).
    # Exact Transformer-XL _rel_shift of a (Q, K) tile:
    #   out[i, j] = padded.flat[Q + i*K + j] with padded = [0 | x] viewed (Q, K+1), i.e. for
    #   d = Q + j - i:   d <= K  -> x[i, d-1]   (per-row lane rotation)
    #                    d == K+1-> 0           (the injected zero column)
    #                    d >  K+1-> x[i+1, d-K-2]  (sublane-rotated copy)
    i_idx = jax.lax.broadcasted_iota(jnp.int32, (qn, kn), 0)
    j_idx = jax.lax.broadcasted_iota(jnp.int32, (qn, kn), 1)
    d = qn + j_idx - i_idx
    take_cur = d <= kn
    is_zero = d == kn + 1

    outs = []
    for h in range(n_head):                  # static (unrolled) per-head loop
        lo, hi = h * d_head, (h + 1) * d_head
        q = q_all[:, lo:hi]                  # (Q, Dh) bf16
        k = k_all[:, lo:hi]                  # (K, Dh) bf16
        v = v_all[:, lo:hi]                  # (K, Dh) bf16
        rk = r_all[:, lo:hi]                 # (R, Dh) bf16

        ac = jax.lax.dot_general(q, k, (((1,), (1,)), ((), ())),
                                 preferred_element_type=jnp.float32)    # (Q, K)
        bd = jax.lax.dot_general(q, rk, (((1,), (1,)), ((), ())),
                                 preferred_element_type=jnp.float32)    # (Q, R == K)

        # shifted[i, j] = bd[i, (j + Q - 1 - i) % K]  (strided lane rotate, XLU)
        shifted = pltpu.roll(bd, (1 - qn) % kn, 1, stride=1, stride_axis=0)
        # nxt[i, j] = shifted[(i + 1) % Q, j]  (wrapped last row is never selected)
        nxt = pltpu.roll(shifted, qn - 1, 0)
        bd_shift = jnp.where(take_cur, shifted, jnp.where(is_zero, 0.0, nxt))

        s = ac + bd_shift                                                # f32 scores
        m = jnp.max(s, axis=-1, keepdims=True)
        p = jnp.exp(s - m)
        l = jnp.sum(p, axis=-1, keepdims=True)
        pv = jnp.dot(p.astype(jnp.bfloat16), v,
                     preferred_element_type=jnp.float32)                 # (Q, Dh)
        outs.append(pv * pl.reciprocal(l, approx=True))

    # Single lane-dense store of all heads.
    o_ref[...] = jnp.concatenate(outs, axis=1).astype(o_ref.dtype)


def fused_attention(qkv_cols, r_k, *, n_head, d_head, bsz):
    # qkv_cols: (qlen, bsz*3*H*Dh) bf16 -- for batch b, columns [b*3HD, (b+1)*3HD) hold the
    #           lane-dense [q | k | v] slab of that batch.  r_k: (rlen, H*Dh) bf16, shared.
    qlen = qkv_cols.shape[0]
    hd = n_head * d_head
    rlen = r_k.shape[0]
    # TODO(synk): for long sequences add flash-style Q/K tiling with an online-softmax
    # accumulator; here each per-head (Q, K) score tile lives wholly in VMEM.
    return pl.pallas_call(
        functools.partial(_attn_kernel, n_head=n_head, d_head=d_head),
        out_shape=jax.ShapeDtypeStruct((qlen, bsz * hd), jnp.bfloat16),
        grid=(bsz,),
        in_specs=[
            pl.BlockSpec((qlen, 3 * hd), lambda b: (0, b)),
            pl.BlockSpec((rlen, hd), lambda b: (0, 0)),
        ],
        out_specs=pl.BlockSpec((qlen, hd), lambda b: (0, b)),
        compiler_params=pltpu.CompilerParams(dimension_semantics=("parallel",)),
    )(qkv_cols, r_k)


# ----------------------------------------------------------------------------
# Output projection + residual + (post-)LayerNorm, fused and row-tiled
# ----------------------------------------------------------------------------
def _out_ln_kernel(a_ref, w_ref, res_ref, g_ref, b_ref, o_ref, *, pre_lnorm, eps):
    proj = jnp.dot(a_ref[...], w_ref[...], preferred_element_type=jnp.float32)
    x = proj + res_ref[...]
    if pre_lnorm:
        o_ref[...] = x
    else:
        mu = jnp.mean(x, axis=-1, keepdims=True)
        xc = x - mu
        var = jnp.mean(xc * xc, axis=-1, keepdims=True)
        o_ref[...] = xc * jax.lax.rsqrt(var + eps) * g_ref[...] + b_ref[...]


def out_project_add_ln(attn2d, o_w_bf16, res2d, g, b, *, pre_lnorm, eps):
    m, hd = attn2d.shape
    d_model = o_w_bf16.shape[1]
    tm = _row_tile(m)
    return pl.pallas_call(
        functools.partial(_out_ln_kernel, pre_lnorm=pre_lnorm, eps=eps),
        out_shape=jax.ShapeDtypeStruct((m, d_model), jnp.float32),
        grid=(m // tm,),
        in_specs=[
            pl.BlockSpec((tm, hd), lambda i: (i, 0)),
            pl.BlockSpec((hd, d_model), lambda i: (0, 0)),
            pl.BlockSpec((tm, d_model), lambda i: (i, 0)),
            pl.BlockSpec((1, d_model), lambda i: (0, 0)),
            pl.BlockSpec((1, d_model), lambda i: (0, 0)),
        ],
        out_specs=pl.BlockSpec((tm, d_model), lambda i: (i, 0)),
        compiler_params=pltpu.CompilerParams(dimension_semantics=("parallel",)),
    )(attn2d, o_w_bf16, res2d, g, b)


# ----------------------------------------------------------------------------
# Forward pass (Pallas)
# ----------------------------------------------------------------------------
def rel_multihead_attn(w, r, params, *, n_head, d_head, pre_lnorm=False, eps=1e-5):
    """w: (qlen, bsz, d_model); r: (rlen, d_model).  Returns (qlen, bsz, d_model) f32."""
    qlen, bsz, d_model = w.shape
    rlen = r.shape[0]
    hd = n_head * d_head
    assert rlen == qlen, "klen == qlen (no mems); AC + rel-shifted BD requires rlen == klen"
    assert (hd % 128 == 0) or bsz == 1, "lane blocking needs n_head*d_head to be a multiple of 128"

    scale = 1.0 / (d_head ** 0.5)

    # Weights go bf16 once (MXU-native); LN params / residual stay f32.
    qkv_w = params["qkv_w"].astype(jnp.bfloat16)           # (d_model, 3*H*Dh)
    o_w = params["o_w"].astype(jnp.bfloat16)               # (H*Dh, d_model)
    ln_g = params["ln_g"].astype(jnp.float32).reshape(1, d_model)
    ln_b = params["ln_b"].astype(jnp.float32).reshape(1, d_model)

    w2d = w.reshape(qlen * bsz, d_model)                   # contiguous view: row = iq*bsz + b

    # 1/sqrt(d_head) applied to the q columns of the projection (scales AC and BD identically).
    col_scale = jnp.concatenate(
        [jnp.full((1, hd), scale, jnp.float32), jnp.ones((1, 2 * hd), jnp.float32)], axis=1)

    # QKV projection with fused pre-LayerNorm (dropout layers are identity in eval mode).
    qkv2d = qkv_project(w2d, qkv_w, col_scale, ln_g, ln_b, pre_lnorm=pre_lnorm, eps=eps)

    # TODO(synk): the base class defines no r_net / r_w_bias / r_r_bias; reuse the K-slice of
    # qkv_net as the relative projection and omit the (undefined) biases.
    r_k = rel_project(r, qkv_w[:, hd:2 * hd])              # (rlen, H*Dh) bf16

    # (qlen*bsz, 3HD) -> (qlen, bsz*3HD): contiguous view; per-batch slabs become lane blocks.
    qkv_cols = qkv2d.reshape(qlen, bsz * 3 * hd)
    attn_cols = fused_attention(qkv_cols, r_k, n_head=n_head, d_head=d_head, bsz=bsz)
    attn2d = attn_cols.reshape(qlen * bsz, hd)             # back to row = iq*bsz + b

    # Output projection + residual + (post-)LayerNorm, fused and row-tiled.
    out2d = out_project_add_ln(attn2d, o_w, w2d, ln_g, ln_b, pre_lnorm=pre_lnorm, eps=eps)
    return out2d.reshape(qlen, bsz, d_model)


# ----------------------------------------------------------------------------
# Pure-JAX f32 reference (same math, torch-exact _rel_shift) for verification
# ----------------------------------------------------------------------------
def _layer_norm(x, g, b, eps):
    mu = jnp.mean(x, axis=-1, keepdims=True)
    xc = x - mu
    var = jnp.mean(xc * xc, axis=-1, keepdims=True)
    return xc * jax.lax.rsqrt(var + eps) * g + b


def rel_multihead_attn_reference(w, r, params, *, n_head, d_head, pre_lnorm=False, eps=1e-5):
    qlen, bsz, d_model = w.shape
    rlen = r.shape[0]
    hd = n_head * d_head
    scale = 1.0 / (d_head ** 0.5)
    qkv_w, o_w = params["qkv_w"], params["o_w"]
    g, b = params["ln_g"], params["ln_b"]

    x = _layer_norm(w, g, b, eps) if pre_lnorm else w
    qkv = jnp.einsum("ibm,mo->ibo", x, qkv_w)
    q, k, v = jnp.split(qkv, 3, axis=-1)
    q = q.reshape(qlen, bsz, n_head, d_head)
    k = k.reshape(qlen, bsz, n_head, d_head)
    v = v.reshape(qlen, bsz, n_head, d_head)
    r_k = jnp.einsum("rm,mo->ro", r, qkv_w[:, hd:2 * hd]).reshape(rlen, n_head, d_head)

    ac = jnp.einsum("ibnd,jbnd->ijbn", q, k)
    bd = jnp.einsum("ibnd,jnd->ijbn", q, r_k)
    # exact torch _rel_shift: pad zero column, view (klen+1, qlen, ...), drop first row
    zero_pad = jnp.zeros((qlen, 1, bsz, n_head), bd.dtype)
    bd_p = jnp.concatenate([zero_pad, bd], axis=1)
    bd_p = bd_p.reshape(rlen + 1, qlen, bsz, n_head)
    bd_s = bd_p[1:].reshape(qlen, rlen, bsz, n_head)

    s = (ac + bd_s) * scale
    p = jax.nn.softmax(s, axis=1)
    attn = jnp.einsum("ijbn,jbnd->ibnd", p, v).reshape(qlen, bsz, hd)
    out = jnp.einsum("ibh,hm->ibm", attn, o_w) + w
    return out if pre_lnorm else _layer_norm(out, g, b, eps)


# ----------------------------------------------------------------------------
# Demo
# ----------------------------------------------------------------------------
if __name__ == "__main__":
    n_head, d_model, d_head = 4, 128, 32
    qlen, bsz, rlen = 128, 2, 128

    key = jax.random.PRNGKey(0)
    k1, k2, k3, k4 = jax.random.split(key, 4)

    params = dict(
        # nn.Linear(d_model, 3*n_head*d_head, bias=False): stored as (in, out) for x @ W.
        qkv_w=0.05 * jax.random.normal(k1, (d_model, 3 * n_head * d_head), jnp.float32),
        # nn.Linear(n_head*d_head, d_model, bias=False): stored as (in, out).
        o_w=0.10 * jax.random.normal(k2, (n_head * d_head, d_model), jnp.float32),
        # nn.LayerNorm(d_model)
        ln_g=jnp.ones((d_model,), jnp.float32),
        ln_b=jnp.zeros((d_model,), jnp.float32),
    )

    w = jax.random.normal(k3, (qlen, bsz, d_model), jnp.float32)
    r = jax.random.normal(k4, (rlen, d_model), jnp.float32)

    for pre_lnorm in (False, True):
        out = rel_multihead_attn(w, r, params, n_head=n_head, d_head=d_head,
                                 pre_lnorm=pre_lnorm)
        out = jax.block_until_ready(out)
        assert out.shape == (qlen, bsz, d_model)
        assert bool(jnp.all(jnp.isfinite(out)))

        ref = rel_multihead_attn_reference(w, r, params, n_head=n_head, d_head=d_head,
                                           pre_lnorm=pre_lnorm)
        ref = jax.block_until_ready(ref)
        diff = jnp.abs(out - ref)
        mean_err = float(jnp.mean(diff))
        max_err = float(jnp.max(diff))
        # bf16 MXU vs f32 reference: expect ~1e-3 mean error; structural errors would be ~1e-1.
        assert mean_err < 1e-2, f"pre_lnorm={pre_lnorm}: mean abs err {mean_err}"
        assert max_err < 1e-1, f"pre_lnorm={pre_lnorm}: max abs err {max_err}"

    print("KERNEL_OK")
</pallas_src>

<mosaic_0001>
module attributes {stable_mosaic.version = 11 : i64} {
  func.func @_qkv_kernel(%arg0: i32, %arg1: memref<256x128xf32, #tpu.memory_space<vmem>>, %arg2: memref<128x384xbf16, #tpu.memory_space<vmem>>, %arg3: memref<1x384xf32, #tpu.memory_space<vmem>>, %arg4: memref<1x128xf32, #tpu.memory_space<vmem>>, %arg5: memref<1x128xf32, #tpu.memory_space<vmem>>, %arg6: memref<256x384xbf16, #tpu.memory_space<vmem>>) attributes {dimension_semantics = [#tpu.dimension_semantics<parallel>], iteration_bounds = array<i64: 1>, scalar_prefetch = 0 : i64, scratch_operands = 0 : i64, tpu.core_type = #tpu.core_type<tc>, window_params = [{transform_indices = @transform_0, window_bounds = array<i64: 256, 128>}, {pipeline_mode = #tpu.pipeline_mode<synchronous>, transform_indices = @transform_1, window_bounds = array<i64: 128, 384>}, {pipeline_mode = #tpu.pipeline_mode<synchronous>, transform_indices = @transform_2, window_bounds = array<i64: 1, 384>}, {pipeline_mode = #tpu.pipeline_mode<synchronous>, transform_indices = @transform_3, window_bounds = array<i64: 1, 128>}, {pipeline_mode = #tpu.pipeline_mode<synchronous>, transform_indices = @transform_4, window_bounds = array<i64: 1, 128>}, {transform_indices = @transform_5, window_bounds = array<i64: 256, 384>}]} {
    %c0 = arith.constant 0 : index
    %c0_0 = arith.constant 0 : index
    %0 = vector.load %arg1[%c0, %c0_0] : memref<256x128xf32, #tpu.memory_space<vmem>>, vector<256x128xf32>
    %1 = arith.truncf %0 : vector<256x128xf32> to vector<256x128xbf16>
    %c0_1 = arith.constant 0 : index
    %c0_2 = arith.constant 0 : index
    %2 = vector.load %arg2[%c0_1, %c0_2] : memref<128x384xbf16, #tpu.memory_space<vmem>>, vector<128x384xbf16>
    %cst = arith.constant dense<0.000000e+00> : vector<256x384xf32>
    %3 = tpu.matmul %1, %2, %cst {dimension_numbers = #tpu.dot_dimension_numbers<[1], [0], [0], [1], [0, 0, 1, 1], [], []>} : vector<256x128xbf16>, vector<128x384xbf16>, vector<256x384xf32> -> vector<256x384xf32>
    %c0_3 = arith.constant 0 : index
    %c0_4 = arith.constant 0 : index
    %4 = vector.load %arg3[%c0_3, %c0_4] : memref<1x384xf32, #tpu.memory_space<vmem>>, vector<1x384xf32>
    %5 = vector.broadcast %4 : vector<1x384xf32> to vector<256x384xf32>
    %6 = arith.mulf %3, %5 : vector<256x384xf32>
    %7 = arith.truncf %6 : vector<256x384xf32> to vector<256x384xbf16>
    %c0_5 = arith.constant 0 : index
    %c0_6 = arith.constant 0 : index
    %8 = vector.load %arg6[%c0_5, %c0_6] : memref<256x384xbf16, #tpu.memory_space<vmem>>, vector<256x384xbf16>
    tpu.vector_store %arg6[%c0_5, %c0_6], %7 {strides = array<i32>} : memref<256x384xbf16, #tpu.memory_space<vmem>>, vector<256x384xbf16>,
    return
  }
  func.func @transform_0(%arg0: i32) -> (i32, i32) {
    %c0_i32 = arith.constant 0 : i32
    %c0_i32_0 = arith.constant 0 : i32
    return %arg0, %c0_i32 : i32, i32
  }
  func.func @transform_1(%arg0: i32) -> (i32, i32) {
    %c0_i32 = arith.constant 0 : i32
    %c0_i32_0 = arith.constant 0 : i32
    %c0_i32_1 = arith.constant 0 : i32
    return %c0_i32, %c0_i32_0 : i32, i32
  }
  func.func @transform_2(%arg0: i32) -> (i32, i32) {
    %c0_i32 = arith.constant 0 : i32
    %c0_i32_0 = arith.constant 0 : i32
    %c0_i32_1 = arith.constant 0 : i32
    return %c0_i32, %c0_i32_0 : i32, i32
  }
  func.func @transform_3(%arg0: i32) -> (i32, i32) {
    %c0_i32 = arith.constant 0 : i32
    %c0_i32_0 = arith.constant 0 : i32
    %c0_i32_1 = arith.constant 0 : i32
    return %c0_i32, %c0_i32_0 : i32, i32
  }
  func.func @transform_4(%arg0: i32) -> (i32, i32) {
    %c0_i32 = arith.constant 0 : i32
    %c0_i32_0 = arith.constant 0 : i32
    %c0_i32_1 = arith.constant 0 : i32
    return %c0_i32, %c0_i32_0 : i32, i32
  }
  func.func @transform_5(%arg0: i32) -> (i32, i32) {
    %c0_i32 = arith.constant 0 : i32
    %c0_i32_0 = arith.constant 0 : i32
    return %arg0, %c0_i32 : i32, i32
  }
}

</mosaic_0001>

<bundles_post_ra>
// kernel: tpu_custom_call.1
= control target key start
LH: loop header
LB: loop body
LE: loop exit
PB: predicated region body
PF: predicated region fallthrough
CT: control target
= control target key end

     0   :  { %10 = vsyncpa [#allocation3], 0  ;;  %s1706_s0 = inlined_call_operand.hbm [shape: f32[256,128], index: 0, kind: input, shape index: {}]   ;;  %s1707_s1 = inlined_call_operand.hbm [shape: bf16[128,384], index: 1, kind: input, shape index: {}]   ;;  %s1708_s2 = inlined_call_operand.vmem [shape: f32[1,384], index: 2, kind: input, shape index: {}]   ;;  %s1709_s3 = inlined_call_operand.vmem [shape: f32[1,128], index: 3, kind: input, shape index: {}]   ;;  %s1710_s4 = inlined_call_operand.vmem [shape: f32[1,128], index: 4, kind: input, shape index: {}]   ;;  %s1711_s5 = inlined_call_operand.hbm [shape: bf16[256,384], index: 5, kind: output, shape index: {}]  }
   0x1   :  { %11 = vsyncpa [#allocation6], 0 }
   0x2   :  { %12 = vsyncpa [#allocation4], 0  ;;  %s1479_s18 = smov [#allocation2]   ;;  %s1407_s22 = scalar_lea.hbm %s1706_s0, 4096 }
   0x3   :  { %s18_s19 = sshll.u32 %s1479_s18, 4  ;;  %p1408_p0 = scmp.ne.s32.totalorder %s1706_s0, %s1407_s22  ;;  %s19_s19 = int_to_ptr.vmem [resolvable:$true] %s18_s19 }
   0x4   :  { %p1411_p1 = scmp.lt.u32.totalorder %s1407_s22, %s1706_s0 }
   0x6   :  { %p1413_p2 = pnand %p1411_p1, %p1408_p0 }
   0x8   :  { %1416 = shalt.err (!%p1413_p2)
}
   0x9   :  { %s1417_s4 = scalar_lea.vmem %s19_s19, 4096  ;;  %p1422_p4 = scmp.lt.s32.totalorder %s19_s19, %s19_s19 }
   0xa   :  { %p1418_p3 = scmp.ne.s32.totalorder %s19_s19, %s1417_s4  ;;  %p1423_p5 = scmp.lt.s32.totalorder %s1417_s4, %s1417_s4 }
   0xc   :  { %p1424_p6 = por %p1423_p5, %p1422_p4 }
   0xe   :  { %p1425_p7 = pnand %p1424_p6, %p1418_p3 }
  0x10   :  { %1428 = shalt.err (!%p1425_p7)
}
  0x11   :  { %s1480_s26 = smov 128   ;;  %s1481_s27 = smov 8  }
  0x12   :  { %24 = dma.hbm_to_vmem [thread:$0]  %s1706_s0, 4096, %s19_s19, [#allocation3], %s1480_s26, %s1480_s26, %s1481_s27  }
  0x13   :  { %s1482_s30 = smov [#allocation5]   ;;  %s1429_s9 = scalar_lea.hbm %s1707_s1, 3072 }
  0x14   :  { %s30_s6 = sshll.u32 %s1482_s30, 4  ;;  %p1430_p8 = scmp.ne.s32.totalorder %s1707_s1, %s1429_s9  ;;  %s31_s6 = int_to_ptr.vmem [resolvable:$true] %s30_s6 }
  0x15   :  { %p1433_p9 = scmp.lt.u32.totalorder %s1429_s9, %s1707_s1 }
  0x17   :  { %p1435_p10 = pnand %p1433_p9, %p1430_p8 }
  0x19   :  { %1438 = shalt.err (!%p1435_p10)
}
  0x1a   :  { %s1439_s14 = scalar_lea.vmem %s31_s6, 3072  ;;  %p1444_p12 = scmp.lt.s32.totalorder %s31_s6, %s31_s6 }
  0x1b   :  { %p1440_p11 = scmp.ne.s32.totalorder %s31_s6, %s1439_s14  ;;  %p1445_p13 = scmp.lt.s32.totalorder %s1439_s14, %s1439_s14 }
  0x1d   :  { %p1446_p0 = por %p1445_p13, %p1444_p12 }
  0x1f   :  { %p1447_p1 = pnand %p1446_p0, %p1440_p11 }
  0x21   :  { %1450 = shalt.err (!%p1447_p1)
}
  0x22   :  { %s1483_s0 = smov 192   ;;  %s1484_s15 = smov 12  }
  0x23   :  { %36 = dma.hbm_to_vmem [thread:$0]  %s1707_s1, 3072, %s31_s6, [#allocation6], %s1483_s0, %s1483_s0, %s1484_s15  }
  0x24   :  { %1473 = dma.done.wait [#allocation3], 4096  }
  0x25   :  { %1474 = vsyncadd [#allocation3], 4294963200 }
  0x26   :  { %1475 = dma.done.wait [#allocation6], 3072  }
  0x27   :  { %1476 = vsyncadd [#allocation6], 4294964224  ;;  %v1485_v0 = vmov 0   ;;  %v1375_v1 = vld [vmem:[#allocation5 + $0x4] ss:$12 sps:$4 sm:$0xff]   ;;  %v51_v18 = vld [vmem:[#allocation2 + $0x8] sm:$0xff] }
  0x28   :  { %290 = vmatprep.mubr.bf16.mxu0 %v1485_v0  ;;  %410 = vmatprep.mubr.bf16.mxu1 %v1485_v0  ;;  %v1377_v2 = vld [vmem:[#allocation5] ss:$12 sps:$4 sm:$0xff]   ;;  %v1378_v3 = vld [vmem:[#allocation5 + $0x1c] ss:$12 sps:$4 sm:$0xff]   ;;  %v1380_v4 = vld [vmem:[#allocation5 + $0x18] ss:$12 sps:$4 sm:$0xff]  }
  0x29   :  { %258 = vmatprep.subr.bf16.mxu0 %v1375_v1  ;;  %1351 = vmatprep.subr.bf16.mxu1 %v1375_v1  ;;  %v1381_v5 = vld [vmem:[#allocation5 + $0x34] ss:$12 sps:$4 sm:$0xff]   ;;  %v1383_v6 = vld [vmem:[#allocation5 + $0x30] ss:$12 sps:$4 sm:$0xff]   ;;  %v1384_v7 = vld [vmem:[#allocation5 + $0x4c] ss:$12 sps:$4 sm:$0xff]  }
  0x2a   :  { %259 = vmatpush1.bf16.msra.mxu0 %v1377_v2  ;;  %1359 = vmatpush1.bf16.msra.mxu1 %v1377_v2  ;;  %v1386_v8 = vld [vmem:[#allocation5 + $0x48] ss:$12 sps:$4 sm:$0xff]   ;;  %v1387_v9 = vld [vmem:[#allocation5 + $0x64] ss:$12 sps:$4 sm:$0xff]   ;;  %v1389_v10 = vld [vmem:[#allocation5 + $0x60] ss:$12 sps:$4 sm:$0xff]  }
  0x2b   :  { %260 = vmatprep.subr.bf16.mxu0 %v1378_v3  ;;  %1352 = vmatprep.subr.bf16.mxu1 %v1378_v3  ;;  %v1390_v11 = vld [vmem:[#allocation5 + $0x7c] ss:$12 sps:$4 sm:$0xff]   ;;  %v1392_v12 = vld [vmem:[#allocation5 + $0x78] ss:$12 sps:$4 sm:$0xff]   ;;  %v1393_v13 = vld [vmem:[#allocation5 + $0x94] ss:$12 sps:$4 sm:$0xff]  }
  0x2c   :  { %v1395_v14 = vld [vmem:[#allocation5 + $0x90] ss:$12 sps:$4 sm:$0xff]   ;;  %v1396_v15 = vld [vmem:[#allocation5 + $0xac] ss:$12 sps:$4 sm:$0xff]   ;;  %v1398_v16 = vld [vmem:[#allocation5 + $0xa8] ss:$12 sps:$4 sm:$0xff]  }
  0x2d   :  { %v50_v17 = vld [vmem:[#allocation2] sm:$0xff]  ;;  %v75_v20 = vld [vmem:[#allocation2 + $0xc8] sm:$0xff]  ;;  %v52_v25 = vld [vmem:[#allocation2 + $0x10] sm:$0xff] }
  0x2e   :  { %261 = vmatpush1.bf16.msra.mxu0 %v1380_v4  ;;  %1360 = vmatpush1.bf16.msra.mxu1 %v1380_v4  ;;  %v74_v19 = vld [vmem:[#allocation2 + $0xc0] sm:$0xff]  ;;  %v1399_v21 = vld [vmem:[#allocation5 + $0x8] ss:$12 sps:$4 sm:$0xff]   ;;  %v82_v22 = vpack.c.bf16 %v51_v18, %v50_v17  ;;  %v53_v26 = vld [vmem:[#allocation2 + $0x18] sm:$0xff] }
  0x2f   :  { %262 = vmatprep.subr.bf16.mxu0 %v1381_v5  ;;  %1353 = vmatprep.subr.bf16.mxu1 %v1381_v5  ;;  %v1546_v23 = vpack.c.bf16 %v75_v20, %v74_v19  ;;  %v1400_v24 = vld [vmem:[#allocation5 + $0x20] ss:$12 sps:$4 sm:$0xff]   ;;  %v76_v27 = vld [vmem:[#allocation2 + $0xd0] sm:$0xff]  ;;  %v77_v28 = vld [vmem:[#allocation2 + $0xd8] sm:$0xff]  ;;  %v83_v30 = vpack.c.bf16 %v53_v26, %v52_v25 }
  0x30   :  { %v1401_v29 = vld [vmem:[#allocation5 + $0x38] ss:$12 sps:$4 sm:$0xff]   ;;  %v1551_v31 = vpack.c.bf16 %v77_v28, %v76_v27  ;;  %v1402_v32 = vld [vmem:[#allocation5 + $0x50] ss:$12 sps:$4 sm:$0xff]   ;;  %v55_v34 = vld [vmem:[#allocation2 + $0x28] sm:$0xff] }
  0x31   :  { %v54_v33 = vld [vmem:[#allocation2 + $0x20] sm:$0xff]  ;;  %v79_v36 = vld [vmem:[#allocation2 + $0xe8] sm:$0xff]  ;;  %v56_v41 = vld [vmem:[#allocation2 + $0x30] sm:$0xff] }
  0x32   :  { %263 = vmatpush1.bf16.msra.mxu0 %v1383_v6  ;;  %1361 = vmatpush1.bf16.msra.mxu1 %v1383_v6  ;;  %v78_v35 = vld [vmem:[#allocation2 + $0xe0] sm:$0xff]  ;;  %v1403_v37 = vld [vmem:[#allocation5 + $0x68] ss:$12 sps:$4 sm:$0xff]   ;;  %v84_v38 = vpack.c.bf16 %v55_v34, %v54_v33  ;;  %v57_v42 = vld [vmem:[#allocation2 + $0x38] sm:$0xff] }
  0x33   :  { %264 = vmatprep.subr.bf16.mxu0 %v1384_v7  ;;  %1354 = vmatprep.subr.bf16.mxu1 %v1384_v7  ;;  %v1556_v39 = vpack.c.bf16 %v79_v36, %v78_v35  ;;  %v1404_v40 = vld [vmem:[#allocation5 + $0x80] ss:$12 sps:$4 sm:$0xff]   ;;  %v80_v43 = vld [vmem:[#allocation2 + $0xf0] sm:$0xff]  ;;  %v81_v44 = vld [vmem:[#allocation2 + $0xf8] sm:$0xff]  ;;  %v85_v46 = vpack.c.bf16 %v57_v42, %v56_v41 }
  0x34   :  { %v1405_v45 = vld [vmem:[#allocation5 + $0x98] ss:$12 sps:$4 sm:$0xff]   ;;  %v1561_v47 = vpack.c.bf16 %v81_v44, %v80_v43  ;;  %v1406_v48 = vld [vmem:[#allocation5 + $0xb0] ss:$12 sps:$4 sm:$0xff]   ;;  %v59_v50 = vld [vmem:[#allocation2 + $0x48] sm:$0xff] }
  0x35   :  { %v58_v49 = vld [vmem:[#allocation2 + $0x40] sm:$0xff]  ;;  %v60_v52 = vld [vmem:[#allocation2 + $0x50] sm:$0xff]  ;;  %v61_v53 = vld [vmem:[#allocation2 + $0x58] sm:$0xff] }
  0x36   :  { %265 = vmatpush1.bf16.msra.mxu0 %v1386_v8  ;;  %1362 = vmatpush1.bf16.msra.mxu1 %v1386_v8  ;;  %v86_v51 = vpack.c.bf16 %v59_v50, %v58_v49  ;;  %v87_v54 = vpack.c.bf16 %v61_v53, %v60_v52  ;;  %v62_v55 = vld [vmem:[#allocation2 + $0x60] sm:$0xff]  ;;  %v63_v56 = vld [vmem:[#allocation2 + $0x68] sm:$0xff]  ;;  %v64_v58 = vld [vmem:[#allocation2 + $0x70] sm:$0xff] }
  0x37   :  { %266 = vmatprep.subr.bf16.mxu0 %v1387_v9  ;;  %1355 = vmatprep.subr.bf16.mxu1 %v1387_v9  ;;  %v88_v57 = vpack.c.bf16 %v63_v56, %v62_v55  ;;  %v65_v59 = vld [vmem:[#allocation2 + $0x78] sm:$0xff]  ;;  %v66_v60 = vld [vmem:[#allocation2 + $0x80] sm:$0xff]  ;;  %v67_v61 = vld [vmem:[#allocation2 + $0x88] sm:$0xff] }
  0x38   :  { %v89_v62 = vpack.c.bf16 %v65_v59, %v64_v58  ;;  %v90_v63 = vpack.c.bf16 %v67_v61, %v66_v60  ;;  %v68_v1 = vld [vmem:[#allocation2 + $0x90] sm:$0xff]  ;;  %v69_v2 = vld [vmem:[#allocation2 + $0x98] sm:$0xff]  ;;  %v70_v3 = vld [vmem:[#allocation2 + $0xa0] sm:$0xff] }
  0x39   :  { %v71_v4 = vld [vmem:[#allocation2 + $0xa8] sm:$0xff]  ;;  %v91_v5 = vpack.c.bf16 %v69_v2, %v68_v1  ;;  %v72_v7 = vld [vmem:[#allocation2 + $0xb0] sm:$0xff]  ;;  %v73_v8 = vld [vmem:[#allocation2 + $0xb8] sm:$0xff] }
  0x3a   :  { %267 = vmatpush1.bf16.msra.mxu0 %v1389_v10  ;;  %1363 = vmatpush1.bf16.msra.mxu1 %v1389_v10  ;;  %v92_v6 = vpack.c.bf16 %v71_v4, %v70_v3  ;;  %v93_v9 = vpack.c.bf16 %v73_v8, %v72_v7  ;;  %v614_v10 = vlaneseq }
  0x3b   :  { %268 = vmatprep.subr.bf16.mxu0 %v1390_v11  ;;  %1356 = vmatprep.subr.bf16.mxu1 %v1390_v11 }
  0x3c   :  { %v1576_v11 = vshrl.u32 %v614_v10, 7 }
  0x3e   :  { %269 = vmatpush1.bf16.msra.mxu0 %v1392_v12  ;;  %1364 = vmatpush1.bf16.msra.mxu1 %v1392_v12  ;;  %v616_v12 = vsub.s32 0, %v1576_v11 }
  0x3f   :  { %270 = vmatprep.subr.bf16.mxu0 %v1393_v13  ;;  %1357 = vmatprep.subr.bf16.mxu1 %v1393_v13  ;;  %v1582_v13 = vld [vmem:[%s1708_s2] sm:$0x7]  ;;  %s1486_s2 = smov [#allocation7]  }
  0x40   :  { %s1114_s19 = sshll.u32 %s1486_s2, 4  ;;  %s1115_s19 = int_to_ptr.vmem [resolvable:$true] %s1114_s19 }
  0x41   :  { %s1451_s20 = scalar_lea.vmem %s1115_s19, 6144  ;;  %p1456_p3 = scmp.lt.s32.totalorder %s1115_s19, %s1115_s19 }
  0x42   :  { %271 = vmatpush1.bf16.msra.mxu0 %v1395_v14  ;;  %1365 = vmatpush1.bf16.msra.mxu1 %v1395_v14  ;;  %v620_v14 = vsub.s32 1, %v1576_v11  ;;  %p1452_p2 = scmp.ne.s32.totalorder %s1115_s19, %s1451_s20  ;;  %p1457_p4 = scmp.lt.s32.totalorder %s1451_s20, %s1451_s20 }
  0x43   :  { %272 = vmatprep.subr.bf16.mxu0 %v1396_v15  ;;  %1358 = vmatprep.subr.bf16.mxu1 %v1396_v15  ;;  %v1586_v15 = vrot.slane %v1582_v13, %v616_v12 }
  0x44   :  { %p1458_p5 = por %p1457_p4, %p1456_p3 }
  0x46   :  { %273 = vmatpush1.bf16.msra.mxu0 %v1398_v16  ;;  %1366 = vmatpush1.bf16.msra.mxu1 %v1398_v16  ;;  %p1459_p6 = pnand %p1458_p5, %p1452_p2 }
  0x47   :  { %1303 = vmatprep.subr.bf16.mxu1 %v1399_v21 }
  0x49   :  { %291 = vmatmul.mubr.bf16.vlgmr.msra.gmra.mrb[0].mxu0 %v82_v22  ;;  %411 = vmatmul.mubr.bf16.vlgmr.msra.gmra.mrb[0].mxu1 %v1546_v23 }
  0x4a   :  { %1304 = vmatpush3.bf16.msra.mxu1 %v1399_v21  ;;  %300 = vmatprep.mubr.bf16.mxu0 %v1485_v0 }
  0x4b   :  { %1305 = vmatprep.subr.bf16.mxu1 %v1400_v24  ;;  %420 = vmatprep.mubr.bf16.mxu1 %v1485_v0 }
  0x4e   :  { %1306 = vmatpush3.bf16.msra.mxu1 %v1400_v24 }
  0x4f   :  { %1307 = vmatprep.subr.bf16.mxu1 %v1401_v29 }
  0x51   :  { %301 = vmatmul.mubr.bf16.gmra.mrb[4].mxu0 %v83_v30  ;;  %421 = vmatmul.mubr.bf16.gmra.mrb[4].mxu1 %v1551_v31 }
  0x52   :  { %1308 = vmatpush3.bf16.msra.mxu1 %v1401_v29  ;;  %310 = vmatprep.mubr.bf16.mxu0 %v1485_v0 }
  0x53   :  { %1309 = vmatprep.subr.bf16.mxu1 %v1402_v32  ;;  %430 = vmatprep.mubr.bf16.mxu1 %v1485_v0 }
  0x56   :  { %1310 = vmatpush3.bf16.msra.mxu1 %v1402_v32 }
  0x57   :  { %1311 = vmatprep.subr.bf16.mxu1 %v1403_v37 }
  0x59   :  { %311 = vmatmul.mubr.bf16.gmra.mrb[8].mxu0 %v84_v38  ;;  %431 = vmatmul.mubr.bf16.gmra.mrb[8].mxu1 %v1556_v39 }
  0x5a   :  { %1312 = vmatpush3.bf16.msra.mxu1 %v1403_v37  ;;  %320 = vmatprep.mubr.bf16.mxu0 %v1485_v0 }
  0x5b   :  { %1313 = vmatprep.subr.bf16.mxu1 %v1404_v40  ;;  %440 = vmatprep.mubr.bf16.mxu1 %v1485_v0 }
  0x5e   :  { %1314 = vmatpush3.bf16.msra.mxu1 %v1404_v40 }
  0x5f   :  { %1315 = vmatprep.subr.bf16.mxu1 %v1405_v45 }
  0x61   :  { %321 = vmatmul.mubr.bf16.gmra.mrb[12].mxu0 %v85_v46  ;;  %441 = vmatmul.mubr.bf16.gmra.mrb[12].mxu1 %v1561_v47 }
  0x62   :  { %1316 = vmatpush3.bf16.msra.mxu1 %v1405_v45  ;;  %330 = vmatprep.mubr.bf16.mxu0 %v1485_v0 }
  0x63   :  { %1317 = vmatprep.subr.bf16.mxu1 %v1406_v48  ;;  %1319 = vmatprep.mubr.bf16.mxu1 %v82_v22 }
  0x66   :  { %1318 = vmatpush3.bf16.msra.mxu1 %v1406_v48 }
  0x69   :  { %331 = vmatmul.mubr.bf16.gmra.mrb[16].mxu0 %v86_v51  ;;  %1320 = vmatmul.mubr.bf16.vlgmr.msra.gmra.mrb[16].mxu1 %v83_v30 }
  0x6a   :  { %340 = vmatprep.mubr.bf16.mxu0 %v1485_v0  ;;  %1323 = vmatprep.mubr.bf16.mxu1 %v84_v38 }
  0x71   :  { %341 = vmatmul.mubr.bf16.gmra.mrb[20].mxu0 %v87_v54  ;;  %1324 = vmatmul.mubr.bf16.gmra.mrb[20].mxu1 %v85_v46 }
  0x72   :  { %350 = vmatprep.mubr.bf16.mxu0 %v1485_v0  ;;  %1327 = vmatprep.mubr.bf16.mxu1 %v86_v51 }
  0x79   :  { %351 = vmatmul.mubr.bf16.gmra.mrb[24].mxu0 %v88_v57  ;;  %1328 = vmatmul.mubr.bf16.gmra.mrb[24].mxu1 %v87_v54 }
  0x7a   :  { %360 = vmatprep.mubr.bf16.mxu0 %v1485_v0  ;;  %1331 = vmatprep.mubr.bf16.mxu1 %v88_v57 }
  0x81   :  { %361 = vmatmul.mubr.bf16.gmra.mrb[28].mxu0 %v89_v62  ;;  %1332 = vmatmul.mubr.bf16.gmra.mrb[28].mxu1 %v89_v62 }
  0x82   :  { %370 = vmatprep.mubr.bf16.mxu0 %v1485_v0  ;;  %1335 = vmatprep.mubr.bf16.mxu1 %v90_v63 }
  0x89   :  { %371 = vmatmul.mubr.bf16.gmra.mrb[32].mxu0 %v90_v63  ;;  %1336 = vmatmul.mubr.bf16.gmra.mrb[32].mxu1 %v91_v5 }
  0x8a   :  { %380 = vmatprep.mubr.bf16.mxu0 %v1485_v0  ;;  %1339 = vmatprep.mubr.bf16.mxu1 %v92_v6 }
  0x91   :  { %381 = vmatmul.mubr.bf16.gmra.mrb[36].mxu0 %v91_v5  ;;  %1340 = vmatmul.mubr.bf16.gmra.mrb[36].mxu1 %v93_v9 }
  0x92   :  { %390 = vmatprep.mubr.bf16.mxu0 %v1485_v0  ;;  %1343 = vmatprep.mubr.bf16.mxu1 %v1546_v23 }
  0x99   :  { %391 = vmatmul.mubr.bf16.gmra.mrb[40].mxu0 %v92_v6  ;;  %1344 = vmatmul.mubr.bf16.gmra.mrb[40].mxu1 %v1551_v31 }
  0x9a   :  { %400 = vmatprep.mubr.bf16.mxu0 %v1485_v0  ;;  %1347 = vmatprep.mubr.bf16.mxu1 %v1556_v39  ;;  %v1589_v0 = vrot.slane %v1582_v13, %v620_v14 }
  0xa1   :  { %401 = vmatmul.mubr.bf16.gmra.mrb[44].mxu0 %v93_v9  ;;  %1348 = vmatmul.mubr.bf16.gmra.mrb[44].mxu1 %v1561_v47 }
 0x11c   :  { %v292_v16 = vpop.f32.mrb[0].mxu0  ;;  %v412_v17 = vpop.f32.mrb[0].mxu1 }
 0x11d   :  { %v629_v18 = vmul.f32 %v1586_v15, %v292_v16  ;;  %v701_v19 = vmul.f32 %v1586_v15, %v412_v17  ;;  %v294_v20 = vpop.f32.mrb[1].mxu0  ;;  %v414_v21 = vpop.f32.mrb[1].mxu1 }
 0x11e   :  { %v630_v22 = vmul.f32 %v1589_v0, %v294_v20  ;;  %v702_v23 = vmul.f32 %v1589_v0, %v414_v21  ;;  %v296_v24 = vpop.f32.mrb[2].mxu0  ;;  %v416_v25 = vpop.f32.mrb[2].mxu1 }
 0x11f   :  { %v632_v26 = vmul.f32 %v1586_v15, %v296_v24  ;;  %v704_v27 = vmul.f32 %v1586_v15, %v416_v25  ;;  %v298_v28 = vpop.f32.mrb[3].mxu0  ;;  %v418_v29 = vpop.f32.mrb[3].mxu1 }
 0x120   :  { %v1215_v30 = vpack.c.bf16 %v630_v22, %v629_v18  ;;  %v1263_v31 = vpack.c.bf16 %v702_v23, %v701_v19  ;;  %v633_v32 = vmul.f32 %v1589_v0, %v298_v28  ;;  %v705_v33 = vmul.f32 %v1589_v0, %v418_v29 }
 0x121   :  { %v624_v22 = vsub.s32 2, %v1576_v11 }
 0x122   :  { %1045 = vst [vmem:[#allocation7] sm:$0xff] %v1215_v30  ;;  %1093 = vst [vmem:[#allocation7 + $0x120] sm:$0xff] %v1263_v31  ;;  %v1217_v34 = vpack.c.bf16 %v633_v32, %v632_v26  ;;  %v1265_v35 = vpack.c.bf16 %v705_v33, %v704_v27 }
 0x123   :  { %v1625_v11 = vrot.slane %v1582_v13, %v624_v22 }
 0x124   :  { %1047 = vst [vmem:[#allocation7 + $0xc] sm:$0xff] %v1217_v34  ;;  %1095 = vst [vmem:[#allocation7 + $0x12c] sm:$0xff] %v1265_v35  ;;  %v302_v36 = vpop.f32.mrb[4].mxu0  ;;  %v422_v37 = vpop.f32.mrb[4].mxu1 }
 0x125   :  { %v635_v38 = vmul.f32 %v1586_v15, %v302_v36  ;;  %v707_v39 = vmul.f32 %v1586_v15, %v422_v37  ;;  %v304_v40 = vpop.f32.mrb[5].mxu0  ;;  %v424_v41 = vpop.f32.mrb[5].mxu1 }
 0x126   :  { %v636_v42 = vmul.f32 %v1589_v0, %v304_v40  ;;  %v708_v43 = vmul.f32 %v1589_v0, %v424_v41  ;;  %v306_v44 = vpop.f32.mrb[6].mxu0  ;;  %v426_v45 = vpop.f32.mrb[6].mxu1 }
 0x127   :  { %v638_v46 = vmul.f32 %v1586_v15, %v306_v44  ;;  %v710_v47 = vmul.f32 %v1586_v15, %v426_v45  ;;  %v308_v48 = vpop.f32.mrb[7].mxu0  ;;  %v428_v49 = vpop.f32.mrb[7].mxu1 }
 0x128   :  { %v1219_v50 = vpack.c.bf16 %v636_v42, %v635_v38  ;;  %v1267_v51 = vpack.c.bf16 %v708_v43, %v707_v39  ;;  %v639_v52 = vmul.f32 %v1589_v0, %v308_v48  ;;  %v711_v53 = vmul.f32 %v1589_v0, %v428_v49 }
 0x12a   :  { %1049 = vst [vmem:[#allocation7 + $0x18] sm:$0xff] %v1219_v50  ;;  %1097 = vst [vmem:[#allocation7 + $0x138] sm:$0xff] %v1267_v51  ;;  %v1221_v54 = vpack.c.bf16 %v639_v52, %v638_v46  ;;  %v1269_v55 = vpack.c.bf16 %v711_v53, %v710_v47 }
 0x12c   :  { %1051 = vst [vmem:[#allocation7 + $0x24] sm:$0xff] %v1221_v54  ;;  %1099 = vst [vmem:[#allocation7 + $0x144] sm:$0xff] %v1269_v55  ;;  %v312_v56 = vpop.f32.mrb[8].mxu0  ;;  %v432_v57 = vpop.f32.mrb[8].mxu1 }
 0x12d   :  { %v641_v58 = vmul.f32 %v1586_v15, %v312_v56  ;;  %v713_v59 = vmul.f32 %v1586_v15, %v432_v57  ;;  %v314_v60 = vpop.f32.mrb[9].mxu0  ;;  %v434_v61 = vpop.f32.mrb[9].mxu1 }
 0x12e   :  { %v642_v62 = vmul.f32 %v1589_v0, %v314_v60  ;;  %v714_v63 = vmul.f32 %v1589_v0, %v434_v61  ;;  %v316_v1 = vpop.f32.mrb[10].mxu0  ;;  %v436_v2 = vpop.f32.mrb[10].mxu1 }
 0x12f   :  { %v644_v3 = vmul.f32 %v1586_v15, %v316_v1  ;;  %v716_v4 = vmul.f32 %v1586_v15, %v436_v2  ;;  %v318_v5 = vpop.f32.mrb[11].mxu0  ;;  %v438_v6 = vpop.f32.mrb[11].mxu1 }
 0x130   :  { %v1223_v7 = vpack.c.bf16 %v642_v62, %v641_v58  ;;  %v1271_v8 = vpack.c.bf16 %v714_v63, %v713_v59  ;;  %v645_v9 = vmul.f32 %v1589_v0, %v318_v5  ;;  %v717_v10 = vmul.f32 %v1589_v0, %v438_v6 }
 0x132   :  { %1053 = vst [vmem:[#allocation7 + $0x30] sm:$0xff] %v1223_v7  ;;  %1101 = vst [vmem:[#allocation7 + $0x150] sm:$0xff] %v1271_v8  ;;  %v1225_v12 = vpack.c.bf16 %v645_v9, %v644_v3  ;;  %v1273_v14 = vpack.c.bf16 %v717_v10, %v716_v4 }
 0x134   :  { %1055 = vst [vmem:[#allocation7 + $0x3c] sm:$0xff] %v1225_v12  ;;  %1103 = vst [vmem:[#allocation7 + $0x15c] sm:$0xff] %v1273_v14  ;;  %v322_v16 = vpop.f32.mrb[12].mxu0  ;;  %v442_v17 = vpop.f32.mrb[12].mxu1 }
 0x135   :  { %v647_v18 = vmul.f32 %v1586_v15, %v322_v16  ;;  %v719_v19 = vmul.f32 %v1586_v15, %v442_v17  ;;  %v324_v20 = vpop.f32.mrb[13].mxu0  ;;  %v444_v21 = vpop.f32.mrb[13].mxu1 }
 0x136   :  { %v648_v23 = vmul.f32 %v1589_v0, %v324_v20  ;;  %v720_v24 = vmul.f32 %v1589_v0, %v444_v21  ;;  %v326_v25 = vpop.f32.mrb[14].mxu0  ;;  %v446_v26 = vpop.f32.mrb[14].mxu1 }
 0x137   :  { %v650_v27 = vmul.f32 %v1586_v15, %v326_v25  ;;  %v722_v28 = vmul.f32 %v1586_v15, %v446_v26  ;;  %v328_v29 = vpop.f32.mrb[15].mxu0  ;;  %v448_v30 = vpop.f32.mrb[15].mxu1 }
 0x138   :  { %v1227_v31 = vpack.c.bf16 %v648_v23, %v647_v18  ;;  %v1275_v32 = vpack.c.bf16 %v720_v24, %v719_v19  ;;  %v651_v33 = vmul.f32 %v1589_v0, %v328_v29  ;;  %v723_v34 = vmul.f32 %v1589_v0, %v448_v30 }
 0x13a   :  { %1057 = vst [vmem:[#allocation7 + $0x48] sm:$0xff] %v1227_v31  ;;  %1105 = vst [vmem:[#allocation7 + $0x168] sm:$0xff] %v1275_v32  ;;  %v1229_v35 = vpack.c.bf16 %v651_v33, %v650_v27  ;;  %v1277_v36 = vpack.c.bf16 %v723_v34, %v722_v28 }
 0x13c   :  { %1059 = vst [vmem:[#allocation7 + $0x54] sm:$0xff] %v1229_v35  ;;  %1107 = vst [vmem:[#allocation7 + $0x174] sm:$0xff] %v1277_v36  ;;  %v332_v37 = vpop.f32.mrb[16].mxu0  ;;  %v1321_v38 = vpop.f32.mrb[16].mxu1 }
 0x13d   :  { %v653_v39 = vmul.f32 %v1586_v15, %v332_v37  ;;  %v637_v40 = vmul.f32 %v1321_v38, %v1625_v11  ;;  %v334_v41 = vpop.f32.mrb[17].mxu0  ;;  %v485_v42 = vpop.f32.mrb[17].mxu1 }
 0x13e   :  { %v654_v43 = vmul.f32 %v1589_v0, %v334_v41  ;;  %v631_v44 = vmul.f32 %v1625_v11, %v485_v42  ;;  %v336_v13 = vpop.f32.mrb[18].mxu0  ;;  %v1322_v45 = vpop.f32.mrb[18].mxu1 }
 0x13f   :  { %v1220_v46 = vpack.c.bf16 %v637_v40, %v637_v40  ;;  %v656_v47 = vmul.f32 %v1586_v15, %v336_v13  ;;  %v640_v48 = vmul.f32 %v1322_v45, %v1625_v11  ;;  %v338_v49 = vpop.f32.mrb[19].mxu0  ;;  %v488_v50 = vpop.f32.mrb[19].mxu1 }
 0x140   :  { %v1231_v51 = vpack.c.bf16 %v654_v43, %v653_v39  ;;  %v1216_v52 = vpack.c.bf16 %v631_v44, %v631_v44  ;;  %v657_v53 = vmul.f32 %v1589_v0, %v338_v49  ;;  %v634_v54 = vmul.f32 %v1625_v11, %v488_v50 }
 0x141   :  { %1050 = vst [vmem:[#allocation7 + $0x20] sm:$0xf] %v1220_v46  ;;  %v1222_v55 = vpack.c.bf16 %v640_v48, %v640_v48 }
 0x142   :  { %1061 = vst [vmem:[#allocation7 + $0x60] sm:$0xff] %v1231_v51  ;;  %1046 = vst [vmem:[#allocation7 + $0x8] sm:$0xf] %v1216_v52  ;;  %v1233_v56 = vpack.c.bf16 %v657_v53, %v656_v47  ;;  %v1218_v57 = vpack.c.bf16 %v634_v54, %v634_v54 }
 0x143   :  { %1052 = vst [vmem:[#allocation7 + $0x2c] sm:$0xf] %v1222_v55 }
 0x144   :  { %1063 = vst [vmem:[#allocation7 + $0x6c] sm:$0xff] %v1233_v56  ;;  %1048 = vst [vmem:[#allocation7 + $0x14] sm:$0xf] %v1218_v57  ;;  %v342_v58 = vpop.f32.mrb[20].mxu0  ;;  %v1325_v59 = vpop.f32.mrb[20].mxu1 }
 0x145   :  { %v659_v60 = vmul.f32 %v1586_v15, %v342_v58  ;;  %v649_v61 = vmul.f32 %v1325_v59, %v1625_v11  ;;  %v344_v62 = vpop.f32.mrb[21].mxu0  ;;  %v501_v63 = vpop.f32.mrb[21].mxu1 }
 0x146   :  { %v660_v1 = vmul.f32 %v1589_v0, %v344_v62  ;;  %v643_v2 = vmul.f32 %v1625_v11, %v501_v63  ;;  %v346_v3 = vpop.f32.mrb[22].mxu0  ;;  %v1326_v4 = vpop.f32.mrb[22].mxu1 }
 0x147   :  { %v1228_v5 = vpack.c.bf16 %v649_v61, %v649_v61  ;;  %v662_v6 = vmul.f32 %v1586_v15, %v346_v3  ;;  %v652_v7 = vmul.f32 %v1326_v4, %v1625_v11  ;;  %v348_v8 = vpop.f32.mrb[23].mxu0  ;;  %v504_v9 = vpop.f32.mrb[23].mxu1 }
 0x148   :  { %v1235_v10 = vpack.c.bf16 %v660_v1, %v659_v60  ;;  %v1224_v12 = vpack.c.bf16 %v643_v2, %v643_v2  ;;  %v663_v14 = vmul.f32 %v1589_v0, %v348_v8  ;;  %v646_v16 = vmul.f32 %v1625_v11, %v504_v9 }
 0x149   :  { %1058 = vst [vmem:[#allocation7 + $0x50] sm:$0xf] %v1228_v5  ;;  %v1230_v17 = vpack.c.bf16 %v652_v7, %v652_v7 }
 0x14a   :  { %1065 = vst [vmem:[#allocation7 + $0x78] sm:$0xff] %v1235_v10  ;;  %1054 = vst [vmem:[#allocation7 + $0x38] sm:$0xf] %v1224_v12  ;;  %v1237_v18 = vpack.c.bf16 %v663_v14, %v662_v6  ;;  %v1226_v19 = vpack.c.bf16 %v646_v16, %v646_v16 }
 0x14b   :  { %1060 = vst [vmem:[#allocation7 + $0x5c] sm:$0xf] %v1230_v17 }
 0x14c   :  { %1067 = vst [vmem:[#allocation7 + $0x84] sm:$0xff] %v1237_v18  ;;  %1056 = vst [vmem:[#allocation7 + $0x44] sm:$0xf] %v1226_v19  ;;  %v352_v20 = vpop.f32.mrb[24].mxu0  ;;  %v1329_v21 = vpop.f32.mrb[24].mxu1 }
 0x14d   :  { %v665_v22 = vmul.f32 %v1586_v15, %v352_v20  ;;  %v661_v23 = vmul.f32 %v1329_v21, %v1625_v11  ;;  %v354_v24 = vpop.f32.mrb[25].mxu0  ;;  %v517_v25 = vpop.f32.mrb[25].mxu1 }
 0x14e   :  { %v666_v26 = vmul.f32 %v1589_v0, %v354_v24  ;;  %v655_v27 = vmul.f32 %v1625_v11, %v517_v25  ;;  %v356_v28 = vpop.f32.mrb[26].mxu0  ;;  %v1330_v29 = vpop.f32.mrb[26].mxu1 }
 0x14f   :  { %v1236_v30 = vpack.c.bf16 %v661_v23, %v661_v23  ;;  %v668_v31 = vmul.f32 %v1586_v15, %v356_v28  ;;  %v664_v32 = vmul.f32 %v1330_v29, %v1625_v11  ;;  %v358_v33 = vpop.f32.mrb[27].mxu0  ;;  %v520_v34 = vpop.f32.mrb[27].mxu1 }
 0x150   :  { %v1239_v35 = vpack.c.bf16 %v666_v26, %v665_v22  ;;  %v1232_v36 = vpack.c.bf16 %v655_v27, %v655_v27  ;;  %v669_v37 = vmul.f32 %v1589_v0, %v358_v33  ;;  %v658_v38 = vmul.f32 %v1625_v11, %v520_v34 }
 0x151   :  { %1066 = vst [vmem:[#allocation7 + $0x80] sm:$0xf] %v1236_v30  ;;  %v1238_v39 = vpack.c.bf16 %v664_v32, %v664_v32 }
 0x152   :  { %1069 = vst [vmem:[#allocation7 + $0x90] sm:$0xff] %v1239_v35  ;;  %1062 = vst [vmem:[#allocation7 + $0x68] sm:$0xf] %v1232_v36  ;;  %v1241_v40 = vpack.c.bf16 %v669_v37, %v668_v31  ;;  %v1234_v41 = vpack.c.bf16 %v658_v38, %v658_v38 }
 0x153   :  { %1068 = vst [vmem:[#allocation7 + $0x8c] sm:$0xf] %v1238_v39 }
 0x154   :  { %1071 = vst [vmem:[#allocation7 + $0x9c] sm:$0xff] %v1241_v40  ;;  %1064 = vst [vmem:[#allocation7 + $0x74] sm:$0xf] %v1234_v41  ;;  %v362_v42 = vpop.f32.mrb[28].mxu0  ;;  %v1333_v43 = vpop.f32.mrb[28].mxu1 }
 0x155   :  { %v671_v44 = vmul.f32 %v1586_v15, %v362_v42  ;;  %v673_v13 = vmul.f32 %v1333_v43, %v1625_v11  ;;  %v364_v45 = vpop.f32.mrb[29].mxu0  ;;  %v533_v46 = vpop.f32.mrb[29].mxu1 }
 0x156   :  { %v672_v47 = vmul.f32 %v1589_v0, %v364_v45  ;;  %v667_v48 = vmul.f32 %v1625_v11, %v533_v46  ;;  %v366_v49 = vpop.f32.mrb[30].mxu0  ;;  %v1334_v50 = vpop.f32.mrb[30].mxu1 }
 0x157   :  { %v1244_v51 = vpack.c.bf16 %v673_v13, %v673_v13  ;;  %v674_v52 = vmul.f32 %v1586_v15, %v366_v49  ;;  %v676_v53 = vmul.f32 %v1334_v50, %v1625_v11  ;;  %v368_v54 = vpop.f32.mrb[31].mxu0  ;;  %v536_v55 = vpop.f32.mrb[31].mxu1 }
 0x158   :  { %v1243_v56 = vpack.c.bf16 %v672_v47, %v671_v44  ;;  %v1240_v57 = vpack.c.bf16 %v667_v48, %v667_v48  ;;  %v675_v58 = vmul.f32 %v1589_v0, %v368_v54  ;;  %v670_v59 = vmul.f32 %v1625_v11, %v536_v55 }
 0x159   :  { %1074 = vst [vmem:[#allocation7 + $0xb0] sm:$0xf] %v1244_v51  ;;  %v1246_v60 = vpack.c.bf16 %v676_v53, %v676_v53 }
 0x15a   :  { %1073 = vst [vmem:[#allocation7 + $0xa8] sm:$0xff] %v1243_v56  ;;  %1070 = vst [vmem:[#allocation7 + $0x98] sm:$0xf] %v1240_v57  ;;  %v1245_v61 = vpack.c.bf16 %v675_v58, %v674_v52  ;;  %v1242_v62 = vpack.c.bf16 %v670_v59, %v670_v59 }
 0x15b   :  { %1076 = vst [vmem:[#allocation7 + $0xbc] sm:$0xf] %v1246_v60 }
 0x15c   :  { %1075 = vst [vmem:[#allocation7 + $0xb4] sm:$0xff] %v1245_v61  ;;  %1072 = vst [vmem:[#allocation7 + $0xa4] sm:$0xf] %v1242_v62  ;;  %v372_v63 = vpop.f32.mrb[32].mxu0  ;;  %v1337_v1 = vpop.f32.mrb[32].mxu1 }
 0x15d   :  { %v677_v2 = vmul.f32 %v1586_v15, %v372_v63  ;;  %v685_v3 = vmul.f32 %v1337_v1, %v1625_v11  ;;  %v374_v4 = vpop.f32.mrb[33].mxu0  ;;  %v549_v5 = vpop.f32.mrb[33].mxu1 }
 0x15e   :  { %v678_v6 = vmul.f32 %v1589_v0, %v374_v4  ;;  %v679_v7 = vmul.f32 %v1625_v11, %v549_v5  ;;  %v376_v8 = vpop.f32.mrb[34].mxu0  ;;  %v1338_v9 = vpop.f32.mrb[34].mxu1 }
 0x15f   :  { %v1252_v10 = vpack.c.bf16 %v685_v3, %v685_v3  ;;  %v680_v12 = vmul.f32 %v1586_v15, %v376_v8  ;;  %v688_v14 = vmul.f32 %v1338_v9, %v1625_v11  ;;  %v378_v16 = vpop.f32.mrb[35].mxu0  ;;  %v552_v17 = vpop.f32.mrb[35].mxu1 }
 0x160   :  { %v1247_v18 = vpack.c.bf16 %v678_v6, %v677_v2  ;;  %v1248_v19 = vpack.c.bf16 %v679_v7, %v679_v7  ;;  %v681_v20 = vmul.f32 %v1589_v0, %v378_v16  ;;  %v682_v21 = vmul.f32 %v1625_v11, %v552_v17 }
 0x161   :  { %1082 = vst [vmem:[#allocation7 + $0xe0] sm:$0xf] %v1252_v10  ;;  %v1254_v22 = vpack.c.bf16 %v688_v14, %v688_v14 }
 0x162   :  { %1077 = vst [vmem:[#allocation7 + $0xc0] sm:$0xff] %v1247_v18  ;;  %1078 = vst [vmem:[#allocation7 + $0xc8] sm:$0xf] %v1248_v19  ;;  %v1249_v23 = vpack.c.bf16 %v681_v20, %v680_v12  ;;  %v1250_v24 = vpack.c.bf16 %v682_v21, %v682_v21 }
 0x163   :  { %1084 = vst [vmem:[#allocation7 + $0xec] sm:$0xf] %v1254_v22 }
 0x164   :  { %1079 = vst [vmem:[#allocation7 + $0xcc] sm:$0xff] %v1249_v23  ;;  %1080 = vst [vmem:[#allocation7 + $0xd4] sm:$0xf] %v1250_v24  ;;  %v382_v25 = vpop.f32.mrb[36].mxu0  ;;  %v1341_v26 = vpop.f32.mrb[36].mxu1 }
 0x165   :  { %v683_v27 = vmul.f32 %v1586_v15, %v382_v25  ;;  %v697_v28 = vmul.f32 %v1341_v26, %v1625_v11  ;;  %v384_v29 = vpop.f32.mrb[37].mxu0  ;;  %v565_v30 = vpop.f32.mrb[37].mxu1 }
 0x166   :  { %v684_v31 = vmul.f32 %v1589_v0, %v384_v29  ;;  %v691_v32 = vmul.f32 %v1625_v11, %v565_v30  ;;  %v386_v33 = vpop.f32.mrb[38].mxu0  ;;  %v1342_v34 = vpop.f32.mrb[38].mxu1 }
 0x167   :  { %v1260_v35 = vpack.c.bf16 %v697_v28, %v697_v28  ;;  %v686_v36 = vmul.f32 %v1586_v15, %v386_v33  ;;  %v700_v37 = vmul.f32 %v1342_v34, %v1625_v11  ;;  %v388_v38 = vpop.f32.mrb[39].mxu0  ;;  %v568_v39 = vpop.f32.mrb[39].mxu1 }
 0x168   :  { %v1251_v40 = vpack.c.bf16 %v684_v31, %v683_v27  ;;  %v1256_v41 = vpack.c.bf16 %v691_v32, %v691_v32  ;;  %v687_v42 = vmul.f32 %v1589_v0, %v388_v38  ;;  %v694_v43 = vmul.f32 %v1625_v11, %v568_v39 }
 0x169   :  { %1090 = vst [vmem:[#allocation7 + $0x110] sm:$0xf] %v1260_v35  ;;  %v1262_v44 = vpack.c.bf16 %v700_v37, %v700_v37 }
 0x16a   :  { %1081 = vst [vmem:[#allocation7 + $0xd8] sm:$0xff] %v1251_v40  ;;  %1086 = vst [vmem:[#allocation7 + $0xf8] sm:$0xf] %v1256_v41  ;;  %v1253_v13 = vpack.c.bf16 %v687_v42, %v686_v36  ;;  %v1258_v45 = vpack.c.bf16 %v694_v43, %v694_v43 }
 0x16b   :  { %1092 = vst [vmem:[#allocation7 + $0x11c] sm:$0xf] %v1262_v44 }
 0x16c   :  { %1083 = vst [vmem:[#allocation7 + $0xe4] sm:$0xff] %v1253_v13  ;;  %1088 = vst [vmem:[#allocation7 + $0x104] sm:$0xf] %v1258_v45  ;;  %v392_v46 = vpop.f32.mrb[40].mxu0  ;;  %v1345_v47 = vpop.f32.mrb[40].mxu1 }
 0x16d   :  { %v689_v48 = vmul.f32 %v1586_v15, %v392_v46  ;;  %v709_v49 = vmul.f32 %v1345_v47, %v1625_v11  ;;  %v394_v50 = vpop.f32.mrb[41].mxu0  ;;  %v581_v51 = vpop.f32.mrb[41].mxu1 }
 0x16e   :  { %v690_v52 = vmul.f32 %v1589_v0, %v394_v50  ;;  %v703_v53 = vmul.f32 %v1625_v11, %v581_v51  ;;  %v396_v54 = vpop.f32.mrb[42].mxu0  ;;  %v1346_v55 = vpop.f32.mrb[42].mxu1 }
 0x16f   :  { %v1268_v56 = vpack.c.bf16 %v709_v49, %v709_v49  ;;  %v692_v57 = vmul.f32 %v1586_v15, %v396_v54  ;;  %v712_v58 = vmul.f32 %v1346_v55, %v1625_v11  ;;  %v398_v59 = vpop.f32.mrb[43].mxu0  ;;  %v584_v60 = vpop.f32.mrb[43].mxu1 }
 0x170   :  { %v1255_v61 = vpack.c.bf16 %v690_v52, %v689_v48  ;;  %v1264_v62 = vpack.c.bf16 %v703_v53, %v703_v53  ;;  %v693_v63 = vmul.f32 %v1589_v0, %v398_v59  ;;  %v706_v1 = vmul.f32 %v1625_v11, %v584_v60 }
 0x171   :  { %1098 = vst [vmem:[#allocation7 + $0x140] sm:$0xf] %v1268_v56  ;;  %v1270_v2 = vpack.c.bf16 %v712_v58, %v712_v58 }
 0x172   :  { %1085 = vst [vmem:[#allocation7 + $0xf0] sm:$0xff] %v1255_v61  ;;  %1094 = vst [vmem:[#allocation7 + $0x128] sm:$0xf] %v1264_v62  ;;  %v1257_v3 = vpack.c.bf16 %v693_v63, %v692_v57  ;;  %v1266_v4 = vpack.c.bf16 %v706_v1, %v706_v1 }
 0x173   :  { %1100 = vst [vmem:[#allocation7 + $0x14c] sm:$0xf] %v1270_v2 }
 0x174   :  { %1087 = vst [vmem:[#allocation7 + $0xfc] sm:$0xff] %v1257_v3  ;;  %1096 = vst [vmem:[#allocation7 + $0x134] sm:$0xf] %v1266_v4  ;;  %v402_v5 = vpop.f32.mrb[44].mxu0  ;;  %v1349_v6 = vpop.f32.mrb[44].mxu1 }
 0x175   :  { %v695_v7 = vmul.f32 %v1586_v15, %v402_v5  ;;  %v721_v8 = vmul.f32 %v1349_v6, %v1625_v11  ;;  %v404_v9 = vpop.f32.mrb[45].mxu0  ;;  %v597_v10 = vpop.f32.mrb[45].mxu1 }
 0x176   :  { %v696_v12 = vmul.f32 %v1589_v0, %v404_v9  ;;  %v715_v14 = vmul.f32 %v1625_v11, %v597_v10  ;;  %v406_v16 = vpop.f32.mrb[46].mxu0  ;;  %v1350_v17 = vpop.f32.mrb[46].mxu1 }
 0x177   :  { %v1276_v18 = vpack.c.bf16 %v721_v8, %v721_v8  ;;  %v698_v19 = vmul.f32 %v1586_v15, %v406_v16  ;;  %v724_v20 = vmul.f32 %v1350_v17, %v1625_v11  ;;  %v408_v21 = vpop.f32.mrb[47].mxu0  ;;  %v600_v22 = vpop.f32.mrb[47].mxu1 }
 0x178   :  { %v1259_v23 = vpack.c.bf16 %v696_v12, %v695_v7  ;;  %v1272_v24 = vpack.c.bf16 %v715_v14, %v715_v14  ;;  %v699_v25 = vmul.f32 %v1589_v0, %v408_v21  ;;  %v718_v26 = vmul.f32 %v1625_v11, %v600_v22 }
 0x179   :  { %1106 = vst [vmem:[#allocation7 + $0x170] sm:$0xf] %v1276_v18  ;;  %v1278_v27 = vpack.c.bf16 %v724_v20, %v724_v20 }
 0x17a   :  { %1089 = vst [vmem:[#allocation7 + $0x108] sm:$0xff] %v1259_v23  ;;  %1102 = vst [vmem:[#allocation7 + $0x158] sm:$0xf] %v1272_v24  ;;  %v1261_v28 = vpack.c.bf16 %v699_v25, %v698_v19  ;;  %v1274_v29 = vpack.c.bf16 %v718_v26, %v718_v26 }
 0x17b   :  { %1108 = vst [vmem:[#allocation7 + $0x17c] sm:$0xf] %v1278_v27 }
 0x17c   :  { %1091 = vst [vmem:[#allocation7 + $0x114] sm:$0xff] %v1261_v28  ;;  %1104 = vst [vmem:[#allocation7 + $0x164] sm:$0xf] %v1274_v29 }
 0x17d   :  { %1462 = shalt.err (!%p1459_p6)
}
 0x17e   :  { %s1463_s23 = scalar_lea.hbm %s1711_s5, 6144 }
 0x17f   :  { %p1464_p7 = scmp.ne.s32.totalorder %s1711_s5, %s1463_s23  ;;  %p1467_p8 = scmp.lt.u32.totalorder %s1463_s23, %s1711_s5 }
 0x181   :  { %p1469_p9 = pnand %p1467_p8, %p1464_p7 }
 0x183   :  { %1472 = shalt.err (!%p1469_p9)
}
 0x184   :  { %1120 = dma.vmem_to_hbm [thread:$0]  %s1115_s19, 6144, %s1711_s5, [#allocation4], %s1483_s0, %s1483_s0, %s1484_s15  }
 0x185   :  { %1477 = dma.done.wait [#allocation4], 6144  }
 0x186   :  { %1478 = vsyncadd [#allocation4], 4294961152 }
 0x187   :  { %1124 = vsyncpa [#allocation3], 1 }
 0x188   :  { %1125 = vsyncpa [#allocation6], 1 }
 0x189   :  { %1126 = vsyncpa [#allocation4], 1 }

</bundles_post_ra>
